<compile_context>
chip_gen: v5e
topology: v5e:2x2
jax: 0.10.0
libtpu: 0.0.40
codegen_flags: <defaults>
</compile_context>

<pallas_src>
import jax
import jax.numpy as jnp
from jax.experimental import pallas as pl
from jax.experimental.pallas import tpu as pltpu

_LANE = 128
_SUBLANE = 8
_HAS_BUFFERED = hasattr(pl, "Buffered")


def _round_up(x, m):
    return ((x + m - 1) // m) * m


def _apply_activation(h, name):
    if name == "relu":
        return jnp.maximum(h, 0.0)
    elif name == "tanh":
        return jnp.tanh(h)
    elif name == "sigmoid":
        return jax.nn.sigmoid(h)
    else:
        raise ValueError(f"Unsupported activation function: {name}")


def _resident_spec(shape):
    """Parameter spec: constant block index, single-buffered (VMEM-resident)."""
    if _HAS_BUFFERED:
        try:
            return pl.BlockSpec(shape, lambda i: (0, 0), pipeline_mode=pl.Buffered(1))
        except TypeError:
            pass
    return pl.BlockSpec(shape, lambda i: (0, 0))


def _make_mlp_kernel(activations, compute_dtype):
    """Fused kernel: (len(activations)+1) Linear layers, activations between."""
    n_linear = len(activations) + 1

    def kernel(*refs):
        # refs = [x_ref, w0, b0, w1, b1, ..., w_{L-1}, b_{L-1}, out_ref]
        x_ref = refs[0]
        out_ref = refs[-1]
        param_refs = refs[1:-1]

        h = x_ref[...].astype(jnp.float32)
        for layer in range(n_linear):
            w_ref = param_refs[2 * layer]
            b_ref = param_refs[2 * layer + 1]
            # Feed the MXU its native dtype; accumulate in f32.
            h = (
                jnp.dot(
                    h.astype(compute_dtype),
                    w_ref[...],
                    preferred_element_type=jnp.float32,
                )
                + b_ref[...]
            )
            if layer < n_linear - 1:
                h = _apply_activation(h, activations[layer])
        out_ref[...] = h.astype(out_ref.dtype)

    return kernel


def prepare_mlp_params(weights, biases, *, compute_dtype=jnp.bfloat16):
    """Pad params to lane multiples ONCE (hoisted out of the forward hot path).

    Weights are cast to `compute_dtype` (bf16 by default: native MXU dtype,
    half the HBM traffic, half the resident-weight VMEM).  Biases stay f32.
    Zero padding is exact even in bf16 (bf16(0) == 0), so padded hidden lanes
    (e.g. sigmoid(0)=0.5) never reach real outputs: the next layer's padded
    weight rows are zero.
    """
    dims = [weights[0].shape[0]] + [w.shape[1] for w in weights]
    dims_p = [_round_up(d, _LANE) for d in dims]
    padded = []
    for li, (w, b) in enumerate(zip(weights, biases)):
        wi, wo = w.shape
        w_p = (
            jnp.zeros((dims_p[li], dims_p[li + 1]), jnp.float32)
            .at[:wi, :wo]
            .set(w)
            .astype(compute_dtype)
        )
        b_p = (
            jnp.zeros((1, dims_p[li + 1]), jnp.float32)
            .at[:, :wo]
            .set(jnp.reshape(b, (1, -1)))
        )
        padded.append((w_p, b_p))
    return padded, dims, dims_p


def mlp_forward(
    x,
    padded_params,
    dims,
    dims_p,
    activations,
    *,
    tile_b=256,
    compute_dtype=jnp.bfloat16,
):
    """Run the fused MLP Pallas kernel on pre-padded parameters.

    x:             (B, input_dim) float32
    padded_params: output of prepare_mlp_params (weights padded & cast, biases padded f32)
    """
    assert len(padded_params) == len(activations) + 1
    B, in_dim = x.shape
    assert in_dim == dims[0]
    out_dim = dims[-1]
    out_dim_p = dims_p[-1]

    # ---- batch tiling: round batch up to sublane, then to a whole grid ----
    B_p = _round_up(B, _SUBLANE)
    TILE_B = min(_round_up(tile_b, _SUBLANE), B_p)
    B_p = _round_up(B_p, TILE_B)
    grid_b = B_p // TILE_B

    # ---- pad x only when needed (skip HBM round trip on the aligned path) ----
    if B_p == B and dims_p[0] == in_dim:
        x_p = x
    else:
        x_p = jnp.zeros((B_p, dims_p[0]), x.dtype).at[:B, :in_dim].set(x)

    args = [x_p]
    in_specs = [pl.BlockSpec((TILE_B, dims_p[0]), lambda i: (i, 0))]
    for w_p, b_p in padded_params:
        args.append(w_p)
        args.append(b_p)
        in_specs.append(_resident_spec(w_p.shape))
        in_specs.append(_resident_spec(b_p.shape))

    out_spec = pl.BlockSpec((TILE_B, out_dim_p), lambda i: (i, 0))

    # ---- advisory cost estimate for XLA scheduling ----
    n_linear = len(padded_params)
    flops = 2 * B_p * sum(dims_p[i] * dims_p[i + 1] for i in range(n_linear))
    transcendentals = sum(
        B_p * dims_p[i + 1]
        for i, a in enumerate(activations)
        if a in ("tanh", "sigmoid")
    )
    bytes_accessed = (
        x_p.size * x_p.dtype.itemsize
        + sum(int(a.size) * a.dtype.itemsize for a in args[1:])
        + B_p * out_dim_p * 4
    )

    # ---- generation-aware VMEM budget from the actual buffer inventory ----
    x_tile_bytes = 2 * TILE_B * dims_p[0] * x_p.dtype.itemsize          # double-buffered
    out_tile_bytes = 2 * TILE_B * out_dim_p * 4                         # double-buffered
    param_buf = 1 if _HAS_BUFFERED else 2
    param_bytes = param_buf * sum(int(a.size) * a.dtype.itemsize for a in args[1:])
    h_scratch_bytes = 2 * TILE_B * max(dims_p) * 4                      # live f32 intermediates
    need = x_tile_bytes + out_tile_bytes + param_bytes + h_scratch_bytes + (4 << 20)
    try:
        cap = int(pltpu.get_tpu_info().vmem_capacity_bytes)
    except Exception:
        cap = 64 << 20  # conservative fallback (v7x per-TC capacity)
    vmem_limit = int(max(16 << 20, min(need, cap - (8 << 20))))

    kernel = _make_mlp_kernel(tuple(activations), compute_dtype)
    out_p = pl.pallas_call(
        kernel,
        out_shape=jax.ShapeDtypeStruct((B_p, out_dim_p), jnp.float32),
        grid=(grid_b,),
        in_specs=in_specs,
        out_specs=out_spec,
        compiler_params=pltpu.CompilerParams(
            dimension_semantics=("parallel",),
            vmem_limit_bytes=vmem_limit,
        ),
        cost_estimate=pl.CostEstimate(
            flops=flops,
            transcendentals=transcendentals,
            bytes_accessed=int(bytes_accessed),
        ),
    )(*args)

    if B_p == B and out_dim_p == out_dim:
        return out_p
    return out_p[:B, :out_dim]


def init_mlp_params(key, input_dim, output_dim, hidden_units):
    """Deterministic parameter init mirroring nn.Linear shapes.
    PyTorch stores W as (out, in); we store the transpose (in, out)."""
    dims = [input_dim] + list(hidden_units) + [output_dim]
    weights, biases = [], []
    for i in range(len(dims) - 1):
        key, kw, kb = jax.random.split(key, 3)
        fan_in = dims[i]
        bound = 1.0 / jnp.sqrt(fan_in)
        w = jax.random.uniform(
            kw, (dims[i], dims[i + 1]), jnp.float32, minval=-bound, maxval=bound
        )
        b = jax.random.uniform(
            kb, (1, dims[i + 1]), jnp.float32, minval=-bound, maxval=bound
        )
        weights.append(w)
        biases.append(b)
    return weights, biases


def mlp_reference(x, weights, biases, activations):
    h = x
    for i, (w, b) in enumerate(zip(weights, biases)):
        h = h @ w + b
        if i < len(weights) - 1:
            h = _apply_activation(h, activations[i])
    return h


if __name__ == "__main__":
    key = jax.random.PRNGKey(0)

    batch = 8
    input_dim = 16
    hidden_units = [32, 32]
    activations = ["relu", "tanh"]
    output_dim = 8

    key, kx = jax.random.split(key)
    x = jax.random.normal(kx, (batch, input_dim), jnp.float32)

    weights, biases = init_mlp_params(key, input_dim, output_dim, hidden_units)
    ref = mlp_reference(x, weights, biases, activations)

    # f32 path: bit-close to PyTorch semantics (tight tolerance).
    params_f32, dims, dims_p = prepare_mlp_params(
        weights, biases, compute_dtype=jnp.float32
    )
    out_f32 = jax.block_until_ready(
        mlp_forward(x, params_f32, dims, dims_p, activations, compute_dtype=jnp.float32)
    )
    assert out_f32.shape == (batch, output_dim)
    assert jnp.allclose(out_f32, ref, atol=1e-5, rtol=1e-5)

    # bf16 MXU path (default perf path): looser tolerance for bf16 mantissa.
    params_bf16, dims, dims_p = prepare_mlp_params(
        weights, biases, compute_dtype=jnp.bfloat16
    )
    out_bf16 = jax.block_until_ready(
        mlp_forward(
            x, params_bf16, dims, dims_p, activations, compute_dtype=jnp.bfloat16
        )
    )
    assert out_bf16.shape == (batch, output_dim)
    assert jnp.allclose(out_bf16, ref, atol=3e-2, rtol=3e-2)

    print("KERNEL_OK")
</pallas_src>

<mosaic_0001>
module attributes {stable_mosaic.version = 11 : i64} {
  func.func @kernel(%arg0: i32, %arg1: memref<8x128xf32, #tpu.memory_space<vmem>>, %arg2: memref<128x128xf32, #tpu.memory_space<vmem>>, %arg3: memref<1x128xf32, #tpu.memory_space<vmem>>, %arg4: memref<128x128xf32, #tpu.memory_space<vmem>>, %arg5: memref<1x128xf32, #tpu.memory_space<vmem>>, %arg6: memref<128x128xf32, #tpu.memory_space<vmem>>, %arg7: memref<1x128xf32, #tpu.memory_space<vmem>>, %arg8: memref<8x128xf32, #tpu.memory_space<vmem>>) attributes {dimension_semantics = [#tpu.dimension_semantics<parallel>], iteration_bounds = array<i64: 1>, scalar_prefetch = 0 : i64, scratch_operands = 0 : i64, tpu.core_type = #tpu.core_type<tc>, window_params = [{transform_indices = @transform_0, window_bounds = array<i64: 8, 128>}, {pipeline_mode = #tpu.pipeline_mode<synchronous>, transform_indices = @transform_1, window_bounds = array<i64: 128, 128>}, {pipeline_mode = #tpu.pipeline_mode<synchronous>, transform_indices = @transform_2, window_bounds = array<i64: 1, 128>}, {pipeline_mode = #tpu.pipeline_mode<synchronous>, transform_indices = @transform_3, window_bounds = array<i64: 128, 128>}, {pipeline_mode = #tpu.pipeline_mode<synchronous>, transform_indices = @transform_4, window_bounds = array<i64: 1, 128>}, {pipeline_mode = #tpu.pipeline_mode<synchronous>, transform_indices = @transform_5, window_bounds = array<i64: 128, 128>}, {pipeline_mode = #tpu.pipeline_mode<synchronous>, transform_indices = @transform_6, window_bounds = array<i64: 1, 128>}, {transform_indices = @transform_7, window_bounds = array<i64: 8, 128>}]} {
    %c0 = arith.constant 0 : index
    %c0_0 = arith.constant 0 : index
    %0 = vector.load %arg1[%c0, %c0_0] : memref<8x128xf32, #tpu.memory_space<vmem>>, vector<8x128xf32>
    %c0_1 = arith.constant 0 : index
    %c0_2 = arith.constant 0 : index
    %1 = vector.load %arg2[%c0_1, %c0_2] : memref<128x128xf32, #tpu.memory_space<vmem>>, vector<128x128xf32>
    %cst = arith.constant dense<0.000000e+00> : vector<8x128xf32>
    %2 = tpu.matmul %0, %1, %cst {dimension_numbers = #tpu.dot_dimension_numbers<[1], [0], [0], [1], [0, 0, 1, 1], [], []>} : vector<8x128xf32>, vector<128x128xf32>, vector<8x128xf32> -> vector<8x128xf32>
    %c0_3 = arith.constant 0 : index
    %c0_4 = arith.constant 0 : index
    %3 = vector.load %arg3[%c0_3, %c0_4] : memref<1x128xf32, #tpu.memory_space<vmem>>, vector<1x128xf32>
    %4 = vector.broadcast %3 : vector<1x128xf32> to vector<8x128xf32>
    %5 = arith.addf %2, %4 : vector<8x128xf32>
    %cst_5 = arith.constant 0.000000e+00 : f32
    %6 = vector.broadcast %cst_5 : f32 to vector<8x128xf32>
    %7 = arith.maximumf %5, %6 : vector<8x128xf32>
    %c0_6 = arith.constant 0 : index
    %c0_7 = arith.constant 0 : index
    %8 = vector.load %arg4[%c0_6, %c0_7] : memref<128x128xf32, #tpu.memory_space<vmem>>, vector<128x128xf32>
    %cst_8 = arith.constant dense<0.000000e+00> : vector<8x128xf32>
    %9 = tpu.matmul %7, %8, %cst_8 {dimension_numbers = #tpu.dot_dimension_numbers<[1], [0], [0], [1], [0, 0, 1, 1], [], []>} : vector<8x128xf32>, vector<128x128xf32>, vector<8x128xf32> -> vector<8x128xf32>
    %c0_9 = arith.constant 0 : index
    %c0_10 = arith.constant 0 : index
    %10 = vector.load %arg5[%c0_9, %c0_10] : memref<1x128xf32, #tpu.memory_space<vmem>>, vector<1x128xf32>
    %11 = vector.broadcast %10 : vector<1x128xf32> to vector<8x128xf32>
    %12 = arith.addf %9, %11 : vector<8x128xf32>
    %13 = math.tanh %12 : vector<8x128xf32>
    %c0_11 = arith.constant 0 : index
    %c0_12 = arith.constant 0 : index
    %14 = vector.load %arg6[%c0_11, %c0_12] : memref<128x128xf32, #tpu.memory_space<vmem>>, vector<128x128xf32>
    %cst_13 = arith.constant dense<0.000000e+00> : vector<8x128xf32>
    %15 = tpu.matmul %13, %14, %cst_13 {dimension_numbers = #tpu.dot_dimension_numbers<[1], [0], [0], [1], [0, 0, 1, 1], [], []>} : vector<8x128xf32>, vector<128x128xf32>, vector<8x128xf32> -> vector<8x128xf32>
    %c0_14 = arith.constant 0 : index
    %c0_15 = arith.constant 0 : index
    %16 = vector.load %arg7[%c0_14, %c0_15] : memref<1x128xf32, #tpu.memory_space<vmem>>, vector<1x128xf32>
    %17 = vector.broadcast %16 : vector<1x128xf32> to vector<8x128xf32>
    %18 = arith.addf %15, %17 : vector<8x128xf32>
    %c0_16 = arith.constant 0 : index
    %c0_17 = arith.constant 0 : index
    %19 = vector.load %arg8[%c0_16, %c0_17] : memref<8x128xf32, #tpu.memory_space<vmem>>, vector<8x128xf32>
    tpu.vector_store %arg8[%c0_16, %c0_17], %18 {strides = array<i32>} : memref<8x128xf32, #tpu.memory_space<vmem>>, vector<8x128xf32>,
    return
  }
  func.func @transform_0(%arg0: i32) -> (i32, i32) {
    %c0_i32 = arith.constant 0 : i32
    %c0_i32_0 = arith.constant 0 : i32
    return %arg0, %c0_i32 : i32, i32
  }
  func.func @transform_1(%arg0: i32) -> (i32, i32) {
    %c0_i32 = arith.constant 0 : i32
    %c0_i32_0 = arith.constant 0 : i32
    %c0_i32_1 = arith.constant 0 : i32
    return %c0_i32, %c0_i32_0 : i32, i32
  }
  func.func @transform_2(%arg0: i32) -> (i32, i32) {
    %c0_i32 = arith.constant 0 : i32
    %c0_i32_0 = arith.constant 0 : i32
    %c0_i32_1 = arith.constant 0 : i32
    return %c0_i32, %c0_i32_0 : i32, i32
  }
  func.func @transform_3(%arg0: i32) -> (i32, i32) {
    %c0_i32 = arith.constant 0 : i32
    %c0_i32_0 = arith.constant 0 : i32
    %c0_i32_1 = arith.constant 0 : i32
    return %c0_i32, %c0_i32_0 : i32, i32
  }
  func.func @transform_4(%arg0: i32) -> (i32, i32) {
    %c0_i32 = arith.constant 0 : i32
    %c0_i32_0 = arith.constant 0 : i32
    %c0_i32_1 = arith.constant 0 : i32
    return %c0_i32, %c0_i32_0 : i32, i32
  }
  func.func @transform_5(%arg0: i32) -> (i32, i32) {
    %c0_i32 = arith.constant 0 : i32
    %c0_i32_0 = arith.constant 0 : i32
    %c0_i32_1 = arith.constant 0 : i32
    return %c0_i32, %c0_i32_0 : i32, i32
  }
  func.func @transform_6(%arg0: i32) -> (i32, i32) {
    %c0_i32 = arith.constant 0 : i32
    %c0_i32_0 = arith.constant 0 : i32
    %c0_i32_1 = arith.constant 0 : i32
    return %c0_i32, %c0_i32_0 : i32, i32
  }
  func.func @transform_7(%arg0: i32) -> (i32, i32) {
    %c0_i32 = arith.constant 0 : i32
    %c0_i32_0 = arith.constant 0 : i32
    return %arg0, %c0_i32 : i32, i32
  }
}

</mosaic_0001>

<bundles_post_ra>
// kernel: tpu_custom_call.1
= control target key start
LH: loop header
LB: loop body
LE: loop exit
PB: predicated region body
PF: predicated region fallthrough
CT: control target
= control target key end

     0   :  { %12 = vsyncpa [#allocation3], 0  ;;  %s442_s0 = inlined_call_operand.hbm [shape: f32[8,128], index: 0, kind: input, shape index: {}]   ;;  %s443_s1 = inlined_call_operand.hbm [shape: f32[128,128], index: 1, kind: input, shape index: {}]   ;;  %s444_s2 = inlined_call_operand.vmem [shape: f32[1,128], index: 2, kind: input, shape index: {}]   ;;  %s445_s3 = inlined_call_operand.hbm [shape: f32[128,128], index: 3, kind: input, shape index: {}]   ;;  %s446_s4 = inlined_call_operand.vmem [shape: f32[1,128], index: 4, kind: input, shape index: {}]   ;;  %s447_s5 = inlined_call_operand.hbm [shape: f32[128,128], index: 5, kind: input, shape index: {}]   ;;  %s448_s6 = inlined_call_operand.vmem [shape: f32[1,128], index: 6, kind: input, shape index: {}]   ;;  %s449_s7 = inlined_call_operand.hbm [shape: f32[8,128], index: 7, kind: output, shape index: {}]  }
   0x1   :  { %13 = vsyncpa [#allocation6], 0 }
   0x2   :  { %14 = vsyncpa [#allocation9], 0  ;;  %s31_s26 = sshll.u32 %s443_s1, 4  ;;  %s32_s26 = int_to_ptr.hbm [resolvable:$true] %s31_s26 }
   0x3   :  { %15 = vsyncpa [#allocation4], 0  ;;  %s371_s27 = smov [#allocation5]   ;;  %s21_s8 = sshll.u32 %s442_s0, 4  ;;  %s22_s8 = int_to_ptr.hbm [resolvable:$true] %s21_s8 }
   0x4   :  { %s33_s28 = sshll.u32 %s371_s27, 4  ;;  %s372_s9 = smov 128   ;;  %s34_s28 = int_to_ptr.vmem [resolvable:$true] %s33_s28 }
   0x5   :  { %s373_s10 = smov 8   ;;  %s374_s11 = smov [#allocation2]  }
   0x6   :  { %39 = dma.hbm_to_vmem [thread:$0]  %s32_s26, 2048, %s34_s28, [#allocation6], %s372_s9, %s372_s9, %s373_s10  }
   0x7   :  { %s23_s12 = sshll.u32 %s374_s11, 4  ;;  %s46_s15 = sshll.u32 %s445_s3, 4  ;;  %s24_s12 = int_to_ptr.vmem [resolvable:$true] %s23_s12  ;;  %s47_s15 = int_to_ptr.hbm [resolvable:$true] %s46_s15 }
   0x8   :  { %26 = dma.hbm_to_vmem [thread:$0]  %s22_s8, 128, %s24_s12, [#allocation3]  }
   0x9   :  { %s61_s17 = sshll.u32 %s447_s5, 4  ;;  %s375_s18 = smov [#allocation7]   ;;  %s62_s17 = int_to_ptr.hbm [resolvable:$true] %s61_s17 }
   0xa   :  { %s48_s19 = sshll.u32 %s375_s18, 4  ;;  %s376_s0 = smov [#allocation8]   ;;  %s49_s19 = int_to_ptr.vmem [resolvable:$true] %s48_s19 }
   0xb   :  { %54 = dma.hbm_to_vmem [thread:$0]  %s47_s15, 2048, %s49_s19, [#allocation6], %s372_s9, %s372_s9, %s373_s10  }
   0xc   :  { %s63_s20 = sshll.u32 %s376_s0, 4  ;;  %s64_s20 = int_to_ptr.vmem [resolvable:$true] %s63_s20 }
   0xd   :  { %69 = dma.hbm_to_vmem [thread:$0]  %s62_s17, 2048, %s64_s20, [#allocation9], %s372_s9, %s372_s9, %s373_s10  }
   0xe   :  { %363 = dma.done.wait [#allocation3], 128  }
   0xf   :  { %364 = vsyncadd [#allocation3], 4294967168 }
  0x10   :  { %365 = dma.done.wait [#allocation6], 4096  }
  0x11   :  { %366 = vsyncadd [#allocation6], 4294963200 }
  0x12   :  { %367 = dma.done.wait [#allocation9], 2048  }
  0x13   :  { %368 = vsyncadd [#allocation9], 4294965248  ;;  %v104_v0 = vld [vmem:[#allocation5 + $0x78] sm:$0xff]  ;;  %v103_v1 = vld [vmem:[#allocation5 + $0x70] sm:$0xff]  ;;  %s377_s24 = smov [#allocation10]   ;;  %s219_s28 = sshll.u32 %s449_s7, 4  ;;  %s220_s28 = int_to_ptr.hbm [resolvable:$true] %s219_s28 }
  0x14   :  { %109 = vmatpush.msra.mxu0 %v104_v0  ;;  %v102_v2 = vld [vmem:[#allocation5 + $0x68] sm:$0xff]  ;;  %v101_v3 = vld [vmem:[#allocation5 + $0x60] sm:$0xff]  ;;  %v145_v4 = vld [vmem:[#allocation7 + $0x78] sm:$0xff]  ;;  %s217_s25 = sshll.u32 %s377_s24, 4  ;;  %s218_s25 = int_to_ptr.vmem [resolvable:$true] %s217_s25 }
  0x15   :  { %v100_v5 = vld [vmem:[#allocation5 + $0x58] sm:$0xff]  ;;  %150 = vmatpush.msra.mxu1 %v145_v4  ;;  %v144_v6 = vld [vmem:[#allocation7 + $0x70] sm:$0xff]  ;;  %v143_v7 = vld [vmem:[#allocation7 + $0x68] sm:$0xff] }
  0x16   :  { %110 = vmatpush.msra.mxu0 %v103_v1  ;;  %v99_v8 = vld [vmem:[#allocation5 + $0x50] sm:$0xff]  ;;  %v142_v9 = vld [vmem:[#allocation7 + $0x60] sm:$0xff]  ;;  %v98_v10 = vld [vmem:[#allocation5 + $0x48] sm:$0xff] }
  0x17   :  { %151 = vmatpush.msra.mxu1 %v144_v6  ;;  %v141_v11 = vld [vmem:[#allocation7 + $0x58] sm:$0xff]  ;;  %v97_v12 = vld [vmem:[#allocation5 + $0x40] sm:$0xff]  ;;  %v140_v13 = vld [vmem:[#allocation7 + $0x50] sm:$0xff] }
  0x18   :  { %111 = vmatpush.msra.mxu0 %v102_v2  ;;  %v96_v14 = vld [vmem:[#allocation5 + $0x38] sm:$0xff]  ;;  %v139_v15 = vld [vmem:[#allocation7 + $0x48] sm:$0xff]  ;;  %v95_v16 = vld [vmem:[#allocation5 + $0x30] sm:$0xff] }
  0x19   :  { %152 = vmatpush.msra.mxu1 %v143_v7  ;;  %v138_v17 = vld [vmem:[#allocation7 + $0x40] sm:$0xff]  ;;  %v94_v18 = vld [vmem:[#allocation5 + $0x28] sm:$0xff]  ;;  %v137_v19 = vld [vmem:[#allocation7 + $0x38] sm:$0xff] }
  0x1a   :  { %112 = vmatpush.msra.mxu0 %v101_v3  ;;  %v93_v20 = vld [vmem:[#allocation5 + $0x20] sm:$0xff]  ;;  %v136_v21 = vld [vmem:[#allocation7 + $0x30] sm:$0xff]  ;;  %v92_v22 = vld [vmem:[#allocation5 + $0x18] sm:$0xff] }
  0x1b   :  { %153 = vmatpush.msra.mxu1 %v142_v9  ;;  %v135_v23 = vld [vmem:[#allocation7 + $0x28] sm:$0xff]  ;;  %v91_v24 = vld [vmem:[#allocation5 + $0x10] sm:$0xff]  ;;  %v134_v25 = vld [vmem:[#allocation7 + $0x20] sm:$0xff] }
  0x1c   :  { %113 = vmatpush.msra.mxu0 %v100_v5  ;;  %v90_v26 = vld [vmem:[#allocation5 + $0x8] sm:$0xff]  ;;  %v133_v27 = vld [vmem:[#allocation7 + $0x18] sm:$0xff]  ;;  %v89_v28 = vld [vmem:[#allocation5] sm:$0xff] }
  0x1d   :  { %154 = vmatpush.msra.mxu1 %v141_v11  ;;  %v88_v29 = vld [vmem:[#allocation2] sm:$0xff]  ;;  %v132_v30 = vld [vmem:[#allocation7 + $0x10] sm:$0xff]  ;;  %v131_v31 = vld [vmem:[#allocation7 + $0x8] sm:$0xff] }
  0x1e   :  { %114 = vmatpush.msra.mxu0 %v99_v8  ;;  %v130_v32 = vld [vmem:[#allocation7] sm:$0xff]  ;;  %v186_v33 = vld [vmem:[#allocation8 + $0x78] sm:$0xff]  ;;  %v185_v34 = vld [vmem:[#allocation8 + $0x70] sm:$0xff] }
  0x1f   :  { %155 = vmatpush.msra.mxu1 %v140_v13  ;;  %191 = vmatpush.msra.mxu2 %v186_v33  ;;  %v184_v35 = vld [vmem:[#allocation8 + $0x68] sm:$0xff]  ;;  %v183_v36 = vld [vmem:[#allocation8 + $0x60] sm:$0xff]  ;;  %v182_v37 = vld [vmem:[#allocation8 + $0x58] sm:$0xff] }
  0x20   :  { %115 = vmatpush.msra.mxu0 %v98_v10  ;;  %v181_v38 = vld [vmem:[#allocation8 + $0x50] sm:$0xff]  ;;  %v180_v39 = vld [vmem:[#allocation8 + $0x48] sm:$0xff]  ;;  %v179_v40 = vld [vmem:[#allocation8 + $0x40] sm:$0xff] }
  0x21   :  { %156 = vmatpush.msra.mxu1 %v139_v15  ;;  %192 = vmatpush.msra.mxu2 %v185_v34  ;;  %v178_v41 = vld [vmem:[#allocation8 + $0x38] sm:$0xff]  ;;  %v177_v42 = vld [vmem:[#allocation8 + $0x30] sm:$0xff]  ;;  %v176_v43 = vld [vmem:[#allocation8 + $0x28] sm:$0xff] }
  0x22   :  { %116 = vmatpush.msra.mxu0 %v97_v12  ;;  %v238_v44 = vld [vmem:[%s444_s2] ss:$0 sm:$0xff]  ;;  %v175_v48 = vld [vmem:[#allocation8 + $0x20] sm:$0xff]  ;;  %v173_v50 = vld [vmem:[#allocation8 + $0x10] sm:$0xff] }
  0x23   :  { %157 = vmatpush.msra.mxu1 %v138_v17  ;;  %193 = vmatpush.msra.mxu2 %v184_v35  ;;  %v174_v49 = vld [vmem:[#allocation8 + $0x18] sm:$0xff]  ;;  %v172_v51 = vld [vmem:[#allocation8 + $0x8] sm:$0xff]  ;;  %v171_v52 = vld [vmem:[#allocation8] sm:$0xff] }
  0x24   :  { %117 = vmatpush.msra.mxu0 %v96_v14  ;;  %v239_v53 = vld [vmem:[%s446_s4] ss:$0 sm:$0xff] }
  0x25   :  { %158 = vmatpush.msra.mxu1 %v137_v19  ;;  %194 = vmatpush.msra.mxu2 %v183_v36  ;;  %v240_v57 = vld [vmem:[%s448_s6] ss:$0 sm:$0xff] }
  0x26   :  { %118 = vmatpush.msra.mxu0 %v95_v16 }
  0x27   :  { %159 = vmatpush.msra.mxu1 %v136_v21  ;;  %195 = vmatpush.msra.mxu2 %v182_v37 }
  0x28   :  { %119 = vmatpush.msra.mxu0 %v94_v18 }
  0x29   :  { %160 = vmatpush.msra.mxu1 %v135_v23  ;;  %196 = vmatpush.msra.mxu2 %v181_v38 }
  0x2a   :  { %120 = vmatpush.msra.mxu0 %v93_v20 }
  0x2b   :  { %161 = vmatpush.msra.mxu1 %v134_v25  ;;  %197 = vmatpush.msra.mxu2 %v180_v39 }
  0x2c   :  { %121 = vmatpush.msra.mxu0 %v92_v22 }
  0x2d   :  { %162 = vmatpush.msra.mxu1 %v133_v27  ;;  %198 = vmatpush.msra.mxu2 %v179_v40 }
  0x2e   :  { %122 = vmatpush.msra.mxu0 %v91_v24 }
  0x2f   :  { %163 = vmatpush.msra.mxu1 %v132_v30  ;;  %199 = vmatpush.msra.mxu2 %v178_v41 }
  0x30   :  { %123 = vmatpush.msra.mxu0 %v90_v26 }
  0x31   :  { %164 = vmatpush.msra.mxu1 %v131_v31  ;;  %200 = vmatpush.msra.mxu2 %v177_v42 }
  0x32   :  { %124 = vmatpush.msra.mxu0 %v89_v28 }
  0x33   :  { %125 = vmatmul.f32.vlgmr.msra.gmra.mxu0 %v88_v29  ;;  %165 = vmatpush.msra.mxu1 %v130_v32 }
  0x34   :  { %201 = vmatpush.msra.mxu2 %v176_v43 }
  0x36   :  { %202 = vmatpush.msra.mxu2 %v175_v48 }
  0x38   :  { %203 = vmatpush.msra.mxu2 %v174_v49 }
  0x3a   :  { %204 = vmatpush.msra.mxu2 %v173_v50 }
  0x3c   :  { %205 = vmatpush.msra.mxu2 %v172_v51 }
  0x3e   :  { %206 = vmatpush.msra.mxu2 %v171_v52 }
  0xb0   :  { %v126_v45 = vpop.f32.mrf.mxu0 }
  0xb1   :  { %v127_v46 = vadd.f32 %v238_v44, %v126_v45 }
  0xb3   :  { %v129_v47 = vmax.f32 %v127_v46, 0.0 }
  0xb5   :  { %166 = vmatmul.f32.vlgmr.msra.gmra.mxu1 %v129_v47 }
 0x132   :  { %v167_v54 = vpop.f32.mrf.mxu1 }
 0x133   :  { %v168_v55 = vadd.f32 %v239_v53, %v167_v54 }
 0x135   :  { %241 = vtanh.f32 %v168_v55 }
 0x13b   :  { %v242_v56 = vpop.eup %241 }
 0x13c   :  { %207 = vmatmul.f32.vlgmr.msra.gmra.mxu2 %v242_v56 }
 0x1bf   :  { %v208_v58 = vpop.f32.mrf.mxu2 }
 0x1c0   :  { %v209_v59 = vadd.f32 %v240_v57, %v208_v58 }
 0x1c2   :  { %211 = vst [vmem:[#allocation10] sm:$0xff] %v209_v59 }
 0x1c3   :  { %222 = dma.vmem_to_hbm [thread:$0]  %s218_s25, 128, %s220_s28, [#allocation4]  }
 0x1c4   :  { %369 = dma.done.wait [#allocation4], 128  }
 0x1c5   :  { %370 = vsyncadd [#allocation4], 4294967168 }
 0x1c6   :  { %227 = vsyncpa [#allocation3], 1 }
 0x1c7   :  { %228 = vsyncpa [#allocation6], 1 }
 0x1c8   :  { %229 = vsyncpa [#allocation9], 1 }
 0x1c9   :  { %230 = vsyncpa [#allocation4], 1 }

</bundles_post_ra>
